<compile_context>
chip_gen: v6e
topology: v6e:2x2x1
jax: 0.10.0
libtpu: 0.0.40
codegen_flags: <defaults>
</compile_context>

<pallas_src>
import functools

import jax
import jax.numpy as jnp
from jax import lax
from jax.experimental import pallas as pl
from jax.experimental.pallas import tpu as pltpu


def _round_up(x, m):
    return (x + m - 1) // m * m


def _vmem_capacity_bytes():
    """Physical VMEM of the current chip; conservative fallback if unknown."""
    try:
        return int(pltpu.get_tpu_info().vmem_capacity_bytes)
    except Exception:
        return 64 << 20  # v7x per-TC physical VMEM (smallest of the three gens)


def _weighted_hinge(cs_ref, *, vrw, lrw, elw, evw, margin, erase_margin):
    """Per-column weighted hinge loss, shape (1, lanes), f32.

    Row layout of cs_ref (matches the contiguous layout of the 1-D cossim):
      0 paired, 1 visual_unpaired, 2 lang_unpaired, 3 lang_erase_paired,
      4 lang_erase_unpaired, 5 visual_erase_paired, 6 visual_erase_unpaired.
    """
    def row(r):
        # Static (1, lanes) ref-row slice; transport dtype -> f32 math.
        return cs_ref[r:r + 1, :].astype(jnp.float32)

    paired = row(0)
    vis_un = row(1)
    lang_un = row(2)
    le_p = row(3)
    le_u = row(4)
    ve_p = row(5)
    ve_u = row(6)
    return (vrw * jnp.maximum(margin + vis_un - paired, 0.0)
            + lrw * jnp.maximum(margin + lang_un - paired, 0.0)
            + elw * jnp.maximum(erase_margin + le_u - le_p, 0.0)
            + evw * jnp.maximum(erase_margin + ve_u - ve_p, 0.0))


def _single_block_kernel(cs_ref, out_ref, *, vrw, lrw, elw, evw, margin,
                         erase_margin, inv_batch):
    # cs_ref: (7, B) VMEM (transport dtype); out_ref: (1, 1) f32 VMEM.
    per_col = _weighted_hinge(cs_ref, vrw=vrw, lrw=lrw, elw=elw, evw=evw,
                              margin=margin, erase_margin=erase_margin)
    out_ref[...] = jnp.sum(per_col, axis=1, keepdims=True) * inv_batch


def _tiled_kernel(cs_ref, out_ref, acc_ref, *, vrw, lrw, elw, evw, margin,
                  erase_margin, inv_batch, block_b, batch_size):
    # cs_ref: (7, block_b) VMEM tile; out_ref: (1, 1) f32 VMEM;
    # acc_ref: (1, block_b) f32 VMEM vector accumulator (lives across grid).
    i = pl.program_id(0)

    @pl.when(i == 0)
    def _():
        acc_ref[...] = jnp.zeros_like(acc_ref)

    per_col = _weighted_hinge(cs_ref, vrw=vrw, lrw=lrw, elw=elw, evw=evw,
                              margin=margin, erase_margin=erase_margin)
    # Mask the ragged / padded tail: global column index < true batch size.
    col = i * block_b + lax.broadcasted_iota(jnp.int32, (1, block_b), 1)
    acc_ref[...] += jnp.where(col < batch_size, per_col, 0.0)  # VPU only

    @pl.when(i == pl.num_programs(0) - 1)
    def _():
        # Single XLU cross-lane reduce + scale, only once at the end.
        out_ref[...] = jnp.sum(acc_ref[...], axis=1, keepdims=True) * inv_batch


def max_margin_erase_criterion(cossim, *, visual_rank_weight, lang_rank_weight,
                               erase_lang_weight, erase_visual_weight,
                               margin, erase_margin,
                               max_single_block_bytes=None,
                               grid_block_lanes=128 * 1024):
    """JAX/Pallas equivalent of MaxMarginEraseCriterion.forward.

    Implements the fully-enabled branch (all weights > 0, N = 7*batch_size).
    """
    # TODO(synk): the partial-erase (N = 5*batch_size) branch of the PyTorch
    # module is not exercised by this config and is not implemented here.
    assert visual_rank_weight > 0 and lang_rank_weight > 0
    assert erase_lang_weight > 0 and erase_visual_weight > 0
    n = cossim.shape[0]
    assert n > 0 and n % 7 == 0, "N must be divisible by 7 (full erase branch)"
    batch_size = n // 7

    # Keep bf16 transport if the producer already gives bf16; math stays f32.
    if cossim.dtype not in (jnp.float32, jnp.bfloat16):
        cossim = cossim.astype(jnp.float32)

    # Free, contiguous metadata reshape -- no HBM round trip in the wrapper.
    cs = cossim.reshape(7, batch_size)

    vmem_cap = _vmem_capacity_bytes()
    if max_single_block_bytes is None:
        # Stay single-block until the resident input is a sizeable fraction of
        # VMEM (chip-derived: ~16 MiB on v5e/v6e, ~8 MiB on v7x).
        max_single_block_bytes = vmem_cap // 8
    vmem_limit = vmem_cap // 2

    scalar_kw = dict(
        vrw=float(visual_rank_weight), lrw=float(lang_rank_weight),
        elw=float(erase_lang_weight), evw=float(erase_visual_weight),
        margin=float(margin), erase_margin=float(erase_margin),
        inv_batch=float(1.0 / batch_size))

    in_bytes = 7 * batch_size * cs.dtype.itemsize
    if in_bytes <= max_single_block_bytes:
        # Single full-array block: one DMA, a few VPU ops, one XLU reduce.
        kernel = functools.partial(_single_block_kernel, **scalar_kw)
        out = pl.pallas_call(
            kernel,
            out_shape=jax.ShapeDtypeStruct((1, 1), jnp.float32),
            in_specs=[pl.BlockSpec(memory_space=pltpu.MemorySpace.VMEM)],
            out_specs=pl.BlockSpec(memory_space=pltpu.MemorySpace.VMEM),
            compiler_params=pltpu.CompilerParams(vmem_limit_bytes=vmem_limit),
        )(cs)
        return out[0, 0]

    # Very-large-B fallback: grid-tile the lane axis with big (multi-MiB) tiles
    # and a vector accumulator in VMEM scratch.
    # TODO(synk): on v7x, a leading size-2 "parallel" axis could split the
    # reduction across the two TensorCores (combine partials in the wrapper).
    assert grid_block_lanes % 128 == 0
    bp128 = _round_up(batch_size, 128)
    n_steps = pl.cdiv(bp128, grid_block_lanes)
    block_b = _round_up(pl.cdiv(bp128, n_steps), 128)   # <= grid_block_lanes
    bp = n_steps * block_b
    if bp != batch_size:
        cs = jnp.pad(cs, ((0, 0), (0, bp - batch_size)))  # pad value irrelevant (masked)

    kernel = functools.partial(_tiled_kernel, block_b=block_b,
                               batch_size=batch_size, **scalar_kw)
    out = pl.pallas_call(
        kernel,
        out_shape=jax.ShapeDtypeStruct((1, 1), jnp.float32),
        grid_spec=pltpu.PrefetchScalarGridSpec(
            num_scalar_prefetch=0,
            grid=(n_steps,),
            in_specs=[pl.BlockSpec((7, block_b), lambda i: (0, i))],
            out_specs=pl.BlockSpec((1, 1), lambda i: (0, 0)),
            scratch_shapes=[pltpu.VMEM((1, block_b), jnp.float32)]),
        compiler_params=pltpu.CompilerParams(
            dimension_semantics=("arbitrary",),
            vmem_limit_bytes=vmem_limit),
    )(cs)
    return out[0, 0]


def _reference(cossim, visual_rank_weight, lang_rank_weight, erase_lang_weight,
               erase_visual_weight, margin, erase_margin):
    # Pure-JAX reference mirroring the PyTorch forward (first branch).
    n = cossim.shape[0]
    b = n // 7
    cossim = cossim.astype(jnp.float32)
    paired = cossim[:b]
    visual_unpaired = cossim[b:2 * b]
    lang_unpaired = cossim[2 * b:3 * b]
    lang_erase_paired = cossim[3 * b:4 * b]
    lang_erase_unpaired = cossim[4 * b:5 * b]
    visual_erase_paired = cossim[5 * b:6 * b]
    visual_erase_unpaired = cossim[6 * b:]
    vr = visual_rank_weight * jnp.clip(margin + visual_unpaired - paired, 0)
    lr = lang_rank_weight * jnp.clip(margin + lang_unpaired - paired, 0)
    ler = erase_lang_weight * jnp.clip(
        erase_margin + lang_erase_unpaired - lang_erase_paired, 0)
    ver = erase_visual_weight * jnp.clip(
        erase_margin + visual_erase_unpaired - visual_erase_paired, 0)
    return (vr + lr + ler + ver).sum() / b


if __name__ == "__main__":
    # Module hyper-parameters (deterministic, set in-script).
    params = dict(
        visual_rank_weight=1.0,
        lang_rank_weight=1.0,
        erase_lang_weight=0.5,
        erase_visual_weight=0.5,
        margin=0.1,
        erase_margin=0.1,
    )

    key = jax.random.PRNGKey(0)

    def run_case(batch_size, **overrides):
        n = 7 * batch_size
        cossim = jax.random.uniform(jax.random.fold_in(key, batch_size),
                                    (n,), dtype=jnp.float32,
                                    minval=-1.0, maxval=1.0)
        loss = max_margin_erase_criterion(cossim, **params, **overrides)
        loss = jax.block_until_ready(loss)
        ref = _reference(cossim, **params)
        assert jnp.allclose(loss, ref, rtol=1e-5, atol=1e-5), \
            (batch_size, float(loss), float(ref))

    # Primary small-shape case: B=16 -> single-block path (whole (7,16) array).
    run_case(16)
    # B=2500 now also runs single-block (70 KiB of input, far under budget).
    run_case(2500)
    # Force the grid-tiled fallback (tiny budget / tiny blocks) to verify the
    # vector-accumulator + tail-masking path end to end: grid=3, block_b=896.
    run_case(2500, max_single_block_bytes=1, grid_block_lanes=1024)

    print("KERNEL_OK")
</pallas_src>

<mosaic_0001>
module attributes {stable_mosaic.version = 11 : i64} {
  func.func @_single_block_kernel(%arg0: memref<7x16xf32, #tpu.memory_space<vmem>>, %arg1: memref<1x1xf32, #tpu.memory_space<vmem>>) attributes {dimension_semantics = [], scalar_prefetch = 0 : i64, scratch_operands = 0 : i64, tpu.core_type = #tpu.core_type<tc>} {
    %c0 = arith.constant 0 : index
    %c0_0 = arith.constant 0 : index
    %0 = vector.load %arg0[%c0, %c0_0] : memref<7x16xf32, #tpu.memory_space<vmem>>, vector<1x16xf32>
    %c1 = arith.constant 1 : index
    %c0_1 = arith.constant 0 : index
    %1 = vector.load %arg0[%c1, %c0_1] : memref<7x16xf32, #tpu.memory_space<vmem>>, vector<1x16xf32>
    %c2 = arith.constant 2 : index
    %c0_2 = arith.constant 0 : index
    %2 = vector.load %arg0[%c2, %c0_2] : memref<7x16xf32, #tpu.memory_space<vmem>>, vector<1x16xf32>
    %c3 = arith.constant 3 : index
    %c0_3 = arith.constant 0 : index
    %3 = vector.load %arg0[%c3, %c0_3] : memref<7x16xf32, #tpu.memory_space<vmem>>, vector<1x16xf32>
    %c4 = arith.constant 4 : index
    %c0_4 = arith.constant 0 : index
    %4 = vector.load %arg0[%c4, %c0_4] : memref<7x16xf32, #tpu.memory_space<vmem>>, vector<1x16xf32>
    %c5 = arith.constant 5 : index
    %c0_5 = arith.constant 0 : index
    %5 = vector.load %arg0[%c5, %c0_5] : memref<7x16xf32, #tpu.memory_space<vmem>>, vector<1x16xf32>
    %c6 = arith.constant 6 : index
    %c0_6 = arith.constant 0 : index
    %6 = vector.load %arg0[%c6, %c0_6] : memref<7x16xf32, #tpu.memory_space<vmem>>, vector<1x16xf32>
    %cst = arith.constant 1.000000e-01 : f32
    %7 = vector.broadcast %cst : f32 to vector<1x16xf32>
    %8 = arith.addf %7, %1 : vector<1x16xf32>
    %9 = arith.subf %8, %0 : vector<1x16xf32>
    %cst_7 = arith.constant 0.000000e+00 : f32
    %10 = vector.broadcast %cst_7 : f32 to vector<1x16xf32>
    %11 = arith.maximumf %9, %10 : vector<1x16xf32>
    %cst_8 = arith.constant 1.000000e+00 : f32
    %12 = vector.broadcast %cst_8 : f32 to vector<1x16xf32>
    %13 = arith.mulf %12, %11 : vector<1x16xf32>
    %cst_9 = arith.constant 1.000000e-01 : f32
    %14 = vector.broadcast %cst_9 : f32 to vector<1x16xf32>
    %15 = arith.addf %14, %2 : vector<1x16xf32>
    %16 = arith.subf %15, %0 : vector<1x16xf32>
    %cst_10 = arith.constant 0.000000e+00 : f32
    %17 = vector.broadcast %cst_10 : f32 to vector<1x16xf32>
    %18 = arith.maximumf %16, %17 : vector<1x16xf32>
    %cst_11 = arith.constant 1.000000e+00 : f32
    %19 = vector.broadcast %cst_11 : f32 to vector<1x16xf32>
    %20 = arith.mulf %19, %18 : vector<1x16xf32>
    %21 = arith.addf %13, %20 : vector<1x16xf32>
    %cst_12 = arith.constant 1.000000e-01 : f32
    %22 = vector.broadcast %cst_12 : f32 to vector<1x16xf32>
    %23 = arith.addf %22, %4 : vector<1x16xf32>
    %24 = arith.subf %23, %3 : vector<1x16xf32>
    %cst_13 = arith.constant 0.000000e+00 : f32
    %25 = vector.broadcast %cst_13 : f32 to vector<1x16xf32>
    %26 = arith.maximumf %24, %25 : vector<1x16xf32>
    %cst_14 = arith.constant 5.000000e-01 : f32
    %27 = vector.broadcast %cst_14 : f32 to vector<1x16xf32>
    %28 = arith.mulf %27, %26 : vector<1x16xf32>
    %29 = arith.addf %21, %28 : vector<1x16xf32>
    %cst_15 = arith.constant 1.000000e-01 : f32
    %30 = vector.broadcast %cst_15 : f32 to vector<1x16xf32>
    %31 = arith.addf %30, %6 : vector<1x16xf32>
    %32 = arith.subf %31, %5 : vector<1x16xf32>
    %cst_16 = arith.constant 0.000000e+00 : f32
    %33 = vector.broadcast %cst_16 : f32 to vector<1x16xf32>
    %34 = arith.maximumf %32, %33 : vector<1x16xf32>
    %cst_17 = arith.constant 5.000000e-01 : f32
    %35 = vector.broadcast %cst_17 : f32 to vector<1x16xf32>
    %36 = arith.mulf %35, %34 : vector<1x16xf32>
    %37 = arith.addf %29, %36 : vector<1x16xf32>
    %cst_18 = arith.constant dense<0.000000e+00> : vector<1xf32>
    %38 = vector.multi_reduction <add>, %37, %cst_18 [1] : vector<1x16xf32> to vector<1xf32>
    %39 = vector.shape_cast %38 : vector<1xf32> to vector<1x1xf32>
    %cst_19 = arith.constant 6.250000e-02 : f32
    %40 = vector.broadcast %cst_19 : f32 to vector<1x1xf32>
    %41 = arith.mulf %39, %40 : vector<1x1xf32>
    %c0_20 = arith.constant 0 : index
    %c0_21 = arith.constant 0 : index
    %42 = vector.load %arg1[%c0_20, %c0_21] : memref<1x1xf32, #tpu.memory_space<vmem>>, vector<1x1xf32>
    tpu.vector_store %arg1[%c0_20, %c0_21], %41 {strides = array<i32>} : memref<1x1xf32, #tpu.memory_space<vmem>>, vector<1x1xf32>,
    return
  }
}

</mosaic_0001>

<bundles_post_ra>
// kernel: tpu_custom_call.1
= control target key start
LH: loop header
LB: loop body
LE: loop exit
PB: predicated region body
PF: predicated region fallthrough
CT: control target
= control target key end

     0   :  { %6 = vsyncpa [#allocation3], 0  ;;  %s131_s0 = inlined_call_operand.hbm [shape: f32[7,16], index: 0, kind: input, shape index: {}]   ;;  %s132_s1 = inlined_call_operand.hbm [shape: f32[1,1], index: 1, kind: output, shape index: {}]  }
   0x1   :  { %7 = vsyncpa [#allocation4], 0  ;;  %s113_s6 = smov [#allocation2]  }
   0x2   :  { %s14_s7 = sshll.u32 %s113_s6, 4  ;;  %s15_s7 = int_to_ptr.vmem [resolvable:$true] %s14_s7 }
   0x3   :  { %s77_s8 = scalar_lea.vmem %s15_s7, 128  ;;  %p82_p1 = scmp.lt.s32.totalorder %s15_s7, %s15_s7 }
   0x4   :  { %p78_p0 = scmp.ne.s32.totalorder %s15_s7, %s77_s8  ;;  %p83_p2 = scmp.lt.s32.totalorder %s77_s8, %s77_s8 }
   0x6   :  { %p84_p3 = por %p83_p2, %p82_p1 }
   0x8   :  { %p85_p4 = pnand %p84_p3, %p78_p0 }
   0xa   :  { %88 = shalt.err (!%p85_p4)
}
   0xb   :  { %17 = dma.hbm_to_vmem [thread:$0]  %s131_s0, 128, %s15_s7, [#allocation3]  }
   0xc   :  { %109 = dma.done.wait [#allocation3], 128  }
   0xd   :  { %110 = vsyncadd [#allocation3], 4294967168  ;;  %v21_v0 = vld [vmem:[#allocation2] sm:$0x1]  ;;  %v22_v1 = vld [vmem:[#allocation2 + $0x1] sm:$0x1] }
   0xe   :  { %v23_v2 = vld [vmem:[#allocation2 + $0x2] sm:$0x1]  ;;  %v24_v3 = vld [vmem:[#allocation2 + $0x3] sm:$0x1]  ;;  %v25_v4 = vld [vmem:[#allocation2 + $0x4] sm:$0x1] }
   0xf   :  { %v26_v5 = vld [vmem:[#allocation2 + $0x5] sm:$0x1]  ;;  %v27_v6 = vld [vmem:[#allocation2 + $0x6] sm:$0x1]  ;;  %v28_v7 = vadd.f32 0.1, %v22_v1 }
  0x10   :  { %v31_v8 = vadd.f32 0.1, %v23_v2  ;;  %v35_v9 = vadd.f32 0.1, %v25_v4  ;;  %v40_v10 = vadd.f32 0.1, %v27_v6 }
  0x11   :  { %v29_v11 = vsub.f32 %v28_v7, %v21_v0  ;;  %vm45_vm0 = vcmask 122880   ;;  %s114_s0 = smov [#allocation5]   ;;  %vm50_vm1 = vcmask 0  }
  0x12   :  { %v32_v12 = vsub.f32 %v31_v8, %v21_v0  ;;  %v36_v13 = vsub.f32 %v35_v9, %v24_v3  ;;  %v41_v14 = vsub.f32 %v40_v10, %v26_v5  ;;  %s58_s11 = sshll.u32 %s114_s0, 4  ;;  %s59_s11 = int_to_ptr.vmem [resolvable:$true] %s58_s11 }
  0x13   :  { %v30_v15 = vmax.f32 %v29_v11, 0.0  ;;  %s89_s12 = scalar_lea.vmem %s59_s11, 16  ;;  %s93_s13 = scalar_lea.vmem %s59_s11, 32 }
  0x14   :  { %v33_v16 = vmax.f32 %v32_v12, 0.0  ;;  %v37_v17 = vmax.f32 %v36_v13, 0.0  ;;  %v42_v18 = vmax.f32 %v41_v14, 0.0  ;;  %p90_p5 = scmp.ne.s32.totalorder %s59_s11, %s89_s12  ;;  %p94_p6 = scmp.lt.s32.totalorder %s59_s11, %s59_s11 }
  0x15   :  { %p95_p7 = scmp.lt.s32.totalorder %s93_s13, %s89_s12 }
  0x16   :  { %v34_v19 = vadd.f32 %v33_v16, %v30_v15  ;;  %v38_v20 = vmul.f32 0.5, %v37_v17  ;;  %v43_v21 = vmul.f32 0.5, %v42_v18 }
  0x17   :  { %p96_p8 = por %p95_p7, %p94_p6 }
  0x18   :  { %v39_v22 = vadd.f32 %v38_v20, %v34_v19 }
  0x19   :  { %p97_p9 = pnand %p96_p8, %p90_p5 }
  0x1a   :  { %v44_v23 = vadd.f32 %v43_v21, %v39_v22 }
  0x1c   :  { %v46_v24 = vsel %vm45_vm0, %v44_v23, 0.0 }
  0x1d   :  { %47 = vadd.xlane.f32.xlu0 %v46_v24 }
  0xa6   :  { %v48_v25 = vpop.xlane.xlu0 %47 }
  0xa7   :  { %v49_v26 = vmul.f32 0.0625, %v48_v25 }
  0xa9   :  { %51 = vst.msk [vmem:[#allocation5] sm:$0x1] %vm50_vm1, %v49_v26 }
  0xaa   :  { %100 = shalt.err (!%p97_p9)
}
  0xab   :  { %61 = dma.vmem_to_hbm [thread:$0]  %s59_s11, 16, %s132_s1, [#allocation4]  }
  0xac   :  { %111 = dma.done.wait [#allocation4], 16  }
  0xad   :  { %112 = vsyncadd [#allocation4], 4294967280 }
  0xae   :  { %65 = vsyncpa [#allocation3], 1 }
  0xaf   :  { %66 = vsyncpa [#allocation4], 1 }

</bundles_post_ra>
